<compile_context>
chip_gen: v6e
topology: v6e:2x2x1
jax: 0.10.0
libtpu: 0.0.40
codegen_flags: <defaults>
</compile_context>

<pallas_src>
import jax
import jax.numpy as jnp
from jax.experimental import pallas as pl
from jax.experimental.pallas import tpu as pltpu


def _round_up(v, m):
    return (v + m - 1) // m * m


def _matmul_bias_kernel(x_ref, w_ref, b_ref, o_ref, acc_ref):
    # grid = (batch tiles i, class tiles j, feature/reduction tiles k)
    k = pl.program_id(2)

    @pl.when(k == 0)
    def _init():
        acc_ref[...] = jnp.zeros_like(acc_ref)

    acc_ref[...] += jnp.dot(
        x_ref[...], w_ref[...], preferred_element_type=jnp.float32
    )

    @pl.when(k == pl.num_programs(2) - 1)
    def _finalize():
        # Bias added only once, in the epilogue (fused add + cast + store).
        o_ref[...] = (
            acc_ref[...] + b_ref[...].astype(jnp.float32)
        ).astype(o_ref.dtype)


def prepare_classifier_params(weight, bias, lane=128):
    """One-time parameter prep.

    PyTorch layout weight (C, D), bias (C,)  ->  w_t (D, Cp), b2d (1, Cp)
    with Cp = round_up(C, 128). Padded lanes are zero so they contribute 0.
    Do this once (at parameter load time), NOT per forward call.
    """
    C, D = weight.shape
    Cp = _round_up(C, lane)
    w_t = jnp.zeros((D, Cp), dtype=weight.dtype).at[:, :C].set(weight.T)
    b2d = jnp.zeros((1, Cp), dtype=bias.dtype).at[0, :C].set(bias)
    return w_t, b2d


def classifier_forward_prepared(x, w_t, b2d, num_classes):
    """y = x @ w_t + b2d, sliced back to (B, num_classes)."""
    B, D = x.shape
    Dw, Cp = w_t.shape
    assert Dw == D and Cp % 128 == 0

    # --- tile selection: 128/256-aligned, well under scoped VMEM on all gens ---
    tm = 256 if B >= 256 else _round_up(B, 8)
    Bp = _round_up(B, tm)
    tn = 256 if (Cp % 256 == 0 and Cp >= 256) else 128
    if D % 512 == 0:
        tk = 512
    elif D % 256 == 0:
        tk = 256
    elif D % 128 == 0:
        tk = 128
    else:
        # TODO(synk): for very large D not divisible by 128, pad D instead of
        # taking the full reduction dim in one block.
        tk = D

    x_p = x if Bp == B else jnp.pad(x, ((0, Bp - B), (0, 0)))

    grid = (Bp // tm, Cp // tn, pl.cdiv(D, tk))

    out_p = pl.pallas_call(
        _matmul_bias_kernel,
        out_shape=jax.ShapeDtypeStruct((Bp, Cp), x.dtype),
        grid_spec=pltpu.PrefetchScalarGridSpec(
            num_scalar_prefetch=0,
            grid=grid,
            in_specs=[
                pl.BlockSpec((tm, tk), lambda i, j, k: (i, k)),   # x tile
                pl.BlockSpec((tk, tn), lambda i, j, k: (k, j)),   # w_t tile
                pl.BlockSpec((1, tn), lambda i, j, k: (0, j)),    # bias tile
            ],
            out_specs=pl.BlockSpec((tm, tn), lambda i, j, k: (i, j)),
            scratch_shapes=[pltpu.VMEM((tm, tn), jnp.float32)],
        ),
        compiler_params=pltpu.CompilerParams(
            dimension_semantics=("parallel", "parallel", "arbitrary"),
            vmem_limit_bytes=32 * 1024 * 1024,
        ),
    )(x_p, w_t, b2d)

    return out_p[:B, :num_classes]


def classifier_forward(x, weight, bias):
    """Convenience one-shot path (PyTorch-layout params)."""
    w_t, b2d = prepare_classifier_params(weight, bias)
    return classifier_forward_prepared(x, w_t, b2d, weight.shape[0])


if __name__ == "__main__":
    # Shapes consistent with the module defaults: input_shape=64, num_classes=10.
    B, D, C = 8, 64, 10

    key = jax.random.PRNGKey(0)
    kx, kw, kb = jax.random.split(key, 3)

    x = jax.random.normal(kx, (B, D), dtype=jnp.float32)
    bound = 1.0 / (D ** 0.5)
    weight = jax.random.uniform(kw, (C, D), dtype=jnp.float32,
                                minval=-bound, maxval=bound)
    bias = jax.random.uniform(kb, (C,), dtype=jnp.float32,
                              minval=-bound, maxval=bound)

    # Prepare params once; jit the forward (num_classes static for the slice).
    w_t, b2d = prepare_classifier_params(weight, bias)
    fwd = jax.jit(classifier_forward_prepared, static_argnums=3)

    out = fwd(x, w_t, b2d, C)
    out = jax.block_until_ready(out)

    # Correctness check against plain-JAX reference of nn.Linear.
    ref = x @ weight.T + bias
    assert out.shape == (B, C)
    assert jnp.allclose(out, ref, atol=1e-5, rtol=1e-5)

    print("KERNEL_OK")
</pallas_src>

<mosaic_0001>
module attributes {stable_mosaic.version = 11 : i64} {
  func.func @_matmul_bias_kernel(%arg0: i32, %arg1: i32, %arg2: i32, %arg3: memref<8x64xf32, #tpu.memory_space<vmem>>, %arg4: memref<64x128xf32, #tpu.memory_space<vmem>>, %arg5: memref<1x128xf32, #tpu.memory_space<vmem>>, %arg6: memref<8x128xf32, #tpu.memory_space<vmem>>, %arg7: memref<8x128xf32, #tpu.memory_space<vmem>>) attributes {dimension_semantics = [#tpu.dimension_semantics<parallel>, #tpu.dimension_semantics<parallel>, #tpu.dimension_semantics<arbitrary>], iteration_bounds = array<i64: 1, 1, 1>, scalar_prefetch = 0 : i64, scratch_operands = 1 : i64, tpu.core_type = #tpu.core_type<tc>, window_params = [{transform_indices = @transform_0, window_bounds = array<i64: 8, 64>}, {transform_indices = @transform_1, window_bounds = array<i64: 64, 128>}, {transform_indices = @transform_2, window_bounds = array<i64: 1, 128>}, {transform_indices = @transform_3, window_bounds = array<i64: 8, 128>}]} {
    %c0_i32 = arith.constant 0 : i32
    %0 = arith.cmpi eq, %arg2, %c0_i32 : i32
    %1 = arith.extui %0 : i1 to i32
    %c0_i32_0 = arith.constant 0 : i32
    %2 = arith.cmpi ne, %1, %c0_i32_0 : i32
    scf.if %2 {
      %cst_10 = arith.constant 0.000000e+00 : f32
      %12 = vector.broadcast %cst_10 : f32 to vector<8x128xf32>
      %c0_11 = arith.constant 0 : index
      %c0_12 = arith.constant 0 : index
      %13 = vector.load %arg7[%c0_11, %c0_12] : memref<8x128xf32, #tpu.memory_space<vmem>>, vector<8x128xf32>
      tpu.vector_store %arg7[%c0_11, %c0_12], %12 {strides = array<i32>} : memref<8x128xf32, #tpu.memory_space<vmem>>, vector<8x128xf32>,
    } else {
    }
    %c0 = arith.constant 0 : index
    %c0_1 = arith.constant 0 : index
    %3 = vector.load %arg7[%c0, %c0_1] : memref<8x128xf32, #tpu.memory_space<vmem>>, vector<8x128xf32>
    %c0_2 = arith.constant 0 : index
    %c0_3 = arith.constant 0 : index
    %4 = vector.load %arg3[%c0_2, %c0_3] : memref<8x64xf32, #tpu.memory_space<vmem>>, vector<8x64xf32>
    %c0_4 = arith.constant 0 : index
    %c0_5 = arith.constant 0 : index
    %5 = vector.load %arg4[%c0_4, %c0_5] : memref<64x128xf32, #tpu.memory_space<vmem>>, vector<64x128xf32>
    %cst = arith.constant dense<0.000000e+00> : vector<8x128xf32>
    %6 = tpu.matmul %4, %5, %cst {dimension_numbers = #tpu.dot_dimension_numbers<[1], [0], [0], [1], [0, 0, 1, 1], [], []>} : vector<8x64xf32>, vector<64x128xf32>, vector<8x128xf32> -> vector<8x128xf32>
    %7 = arith.addf %3, %6 : vector<8x128xf32>
    %c0_6 = arith.constant 0 : index
    %c0_7 = arith.constant 0 : index
    %8 = vector.load %arg7[%c0_6, %c0_7] : memref<8x128xf32, #tpu.memory_space<vmem>>, vector<8x128xf32>
    tpu.vector_store %arg7[%c0_6, %c0_7], %7 {strides = array<i32>} : memref<8x128xf32, #tpu.memory_space<vmem>>, vector<8x128xf32>,
    %c0_i32_8 = arith.constant 0 : i32
    %9 = arith.cmpi eq, %arg2, %c0_i32_8 : i32
    %10 = arith.extui %9 : i1 to i32
    %c0_i32_9 = arith.constant 0 : i32
    %11 = arith.cmpi ne, %10, %c0_i32_9 : i32
    scf.if %11 {
      %c0_10 = arith.constant 0 : index
      %c0_11 = arith.constant 0 : index
      %12 = vector.load %arg7[%c0_10, %c0_11] : memref<8x128xf32, #tpu.memory_space<vmem>>, vector<8x128xf32>
      %c0_12 = arith.constant 0 : index
      %c0_13 = arith.constant 0 : index
      %13 = vector.load %arg5[%c0_12, %c0_13] : memref<1x128xf32, #tpu.memory_space<vmem>>, vector<1x128xf32>
      %14 = vector.broadcast %13 : vector<1x128xf32> to vector<8x128xf32>
      %15 = arith.addf %12, %14 : vector<8x128xf32>
      %c0_14 = arith.constant 0 : index
      %c0_15 = arith.constant 0 : index
      %16 = vector.load %arg6[%c0_14, %c0_15] : memref<8x128xf32, #tpu.memory_space<vmem>>, vector<8x128xf32>
      tpu.vector_store %arg6[%c0_14, %c0_15], %15 {strides = array<i32>} : memref<8x128xf32, #tpu.memory_space<vmem>>, vector<8x128xf32>,
    } else {
    }
    return
  }
  func.func @transform_0(%arg0: i32, %arg1: i32, %arg2: i32) -> (i32, i32) {
    %c0_i32 = arith.constant 0 : i32
    return %arg0, %arg2 : i32, i32
  }
  func.func @transform_1(%arg0: i32, %arg1: i32, %arg2: i32) -> (i32, i32) {
    %c0_i32 = arith.constant 0 : i32
    return %arg2, %arg1 : i32, i32
  }
  func.func @transform_2(%arg0: i32, %arg1: i32, %arg2: i32) -> (i32, i32) {
    %c0_i32 = arith.constant 0 : i32
    %c0_i32_0 = arith.constant 0 : i32
    return %c0_i32, %arg1 : i32, i32
  }
  func.func @transform_3(%arg0: i32, %arg1: i32, %arg2: i32) -> (i32, i32) {
    %c0_i32 = arith.constant 0 : i32
    return %arg0, %arg1 : i32, i32
  }
}

</mosaic_0001>

<bundles_post_ra>
// kernel: classifier_forward_prepared.1
= control target key start
LH: loop header
LB: loop body
LE: loop exit
PB: predicated region body
PF: predicated region fallthrough
CT: control target
= control target key end

     0   :  { %8 = vsyncpa [#allocation4], 0  ;;  %s303_s0 = inlined_call_operand.hbm [shape: f32[8,64], index: 0, kind: input, shape index: {}]   ;;  %s304_s1 = inlined_call_operand.hbm [shape: f32[64,128], index: 1, kind: input, shape index: {}]   ;;  %s305_s2 = inlined_call_operand.vmem [shape: f32[1,128], index: 2, kind: input, shape index: {}]   ;;  %s306_s3 = inlined_call_operand.hbm [shape: f32[8,128], index: 3, kind: output, shape index: {}]  }
   0x1   :  { %9 = vsyncpa [#allocation7], 0 }
   0x2   :  { %10 = vsyncpa [#allocation5], 0  ;;  %s264_s12 = smov [#allocation3]   ;;  %s265_s14 = smov [#allocation6]  }
   0x3   :  { %s17_s13 = sshll.u32 %s264_s12, 4  ;;  %s26_s15 = sshll.u32 %s265_s14, 4  ;;  %s18_s13 = int_to_ptr.vmem [resolvable:$true] %s17_s13  ;;  %s27_s15 = int_to_ptr.vmem [resolvable:$true] %s26_s15 }
   0x4   :  { %s206_s16 = scalar_lea.vmem %s18_s13, 128  ;;  %p211_p1 = scmp.lt.s32.totalorder %s18_s13, %s18_s13 }
   0x5   :  { %p207_p0 = scmp.ne.s32.totalorder %s18_s13, %s206_s16  ;;  %p212_p2 = scmp.lt.s32.totalorder %s206_s16, %s206_s16 }
   0x7   :  { %p213_p3 = por %p212_p2, %p211_p1 }
   0x9   :  { %p214_p4 = pnand %p213_p3, %p207_p0 }
   0xb   :  { %217 = shalt.err (!%p214_p4)
}
   0xc   :  { %20 = dma.hbm_to_vmem [thread:$0]  %s303_s0, 128, %s18_s13, [#allocation4]  }
   0xd   :  { %s226_s19 = scalar_lea.vmem %s27_s15, 1024  ;;  %p231_p6 = scmp.lt.s32.totalorder %s27_s15, %s27_s15 }
   0xe   :  { %p227_p5 = scmp.ne.s32.totalorder %s27_s15, %s226_s19  ;;  %p232_p7 = scmp.lt.s32.totalorder %s226_s19, %s226_s19 }
  0x10   :  { %p233_p8 = por %p232_p7, %p231_p6 }
  0x12   :  { %p234_p9 = pnand %p233_p8, %p227_p5 }
  0x14   :  { %237 = shalt.err (!%p234_p9)
}
  0x15   :  { %s266_s20 = smov 128   ;;  %s267_s21 = smov 8  }
  0x16   :  { %32 = dma.hbm_to_vmem [thread:$0]  %s304_s1, 1024, %s27_s15, [#allocation7], %s266_s20, %s266_s20, %s267_s21  }
  0x17   :  { %258 = dma.done.wait [#allocation4], 128  }
  0x18   :  { %259 = vsyncadd [#allocation4], 4294967168 }
  0x19   :  { %260 = dma.done.wait [#allocation7], 1024  }
  0x1a   :  { %261 = vsyncadd [#allocation7], 4294966272  ;;  %v268_v0 = vmov 0.0   ;;  %vm269_vm0 = vmmov 0   ;;  %v55_v1 = vld [vmem:[#allocation6 + $0x38] sm:$0xff]  ;;  %v54_v2 = vld [vmem:[#allocation6 + $0x30] sm:$0xff] }
  0x1b   :  { %172 = vmatprep.subr.mxu0 %v268_v0  ;;  %188 = vmatprep.mubr.msk.f32.mxu0 %vm269_vm0, %v268_v0  ;;  %v53_v3 = vld [vmem:[#allocation6 + $0x28] sm:$0xff]  ;;  %v52_v4 = vld [vmem:[#allocation6 + $0x20] sm:$0xff]  ;;  %v51_v5 = vld [vmem:[#allocation6 + $0x18] sm:$0xff]  ;;  %vm56_vm1 = vcmask 523264   ;;  %s270_s24 = smov [#allocation8]  }
  0x1c   :  { %173 = vmatpush3.msra.mxu0 %v55_v1  ;;  %v50_v6 = vld [vmem:[#allocation6 + $0x10] sm:$0xff]  ;;  %v49_v7 = vld [vmem:[#allocation6 + $0x8] sm:$0xff]  ;;  %v48_v8 = vld [vmem:[#allocation6] sm:$0xff]  ;;  %s151_s25 = sshll.u32 %s270_s24, 4  ;;  %s152_s25 = int_to_ptr.vmem [resolvable:$true] %s151_s25 }
  0x1d   :  { %174 = vmatprep.subr.mxu0 %v268_v0  ;;  %v47_v9 = vld [vmem:[#allocation3] sm:$0xff]  ;;  %s238_s26 = scalar_lea.vmem %s152_s25, 128  ;;  %p243_p11 = scmp.lt.s32.totalorder %s152_s25, %s152_s25 }
  0x1e   :  { %175 = vmatpush3.msra.mxu0 %v54_v2  ;;  %v162_v10 = vld [vmem:[%s305_s2] ss:$0 sm:$0xff]  ;;  %p239_p10 = scmp.ne.s32.totalorder %s152_s25, %s238_s26  ;;  %p244_p12 = scmp.lt.s32.totalorder %s238_s26, %s238_s26 }
  0x1f   :  { %176 = vmatprep.subr.mxu0 %v268_v0 }
  0x20   :  { %177 = vmatpush3.msra.mxu0 %v53_v3  ;;  %p245_p13 = por %p244_p12, %p243_p11 }
  0x21   :  { %178 = vmatprep.subr.mxu0 %v268_v0 }
  0x22   :  { %179 = vmatpush3.msra.mxu0 %v52_v4  ;;  %p246_p0 = pnand %p245_p13, %p239_p10 }
  0x23   :  { %180 = vmatprep.subr.mxu0 %v268_v0 }
  0x24   :  { %181 = vmatpush3.msra.mxu0 %v51_v5 }
  0x25   :  { %182 = vmatprep.subr.mxu0 %v268_v0 }
  0x26   :  { %183 = vmatpush3.msra.mxu0 %v50_v6 }
  0x27   :  { %184 = vmatprep.subr.mxu0 %v268_v0 }
  0x28   :  { %185 = vmatpush3.msra.mxu0 %v49_v7 }
  0x29   :  { %186 = vmatprep.subr.mxu0 %v268_v0 }
  0x2a   :  { %187 = vmatpush3.msra.mxu0 %v48_v8 }
  0x2b   :  { %189 = vmatmul.mubr.msk.f32.vlgmr.msra.gmra.mxu0 %vm56_vm1, %v47_v9 }
  0xeb   :  { %v126_v11 = vpop.f32.mrf.mxu0 }
  0xec   :  { %v143_v12 = vadd.f32 %v162_v10, %v126_v11 }
  0xed   :  { %v190_v13 = vpop.f32.mrf.mxu0 }
  0xee   :  { %144 = vst [vmem:[#allocation8] sm:$0xff] %v143_v12 }
  0xef   :  { %249 = shalt.err (!%p246_p0)
}
  0xf0   :  { %154 = dma.vmem_to_hbm [thread:$0]  %s152_s25, 128, %s306_s3, [#allocation5]  }
  0xf1   :  { %262 = dma.done.wait [#allocation5], 128  }
  0xf2   :  { %263 = vsyncadd [#allocation5], 4294967168 }
  0xf3   :  { %158 = vsyncpa [#allocation4], 1 }
  0xf4   :  { %159 = vsyncpa [#allocation7], 1 }
  0xf5   :  { %160 = vsyncpa [#allocation5], 1 }

</bundles_post_ra>
